<compile_context>
chip_gen: v5e
topology: v5e:2x2
jax: 0.10.0
libtpu: 0.0.40
codegen_flags: <defaults>
</compile_context>

<pallas_src>
import functools

import jax
import jax.numpy as jnp
from jax import lax
from jax.experimental import pallas as pl
from jax.experimental.pallas import tpu as pltpu

BN_EPS = 1e-5      # nn.BatchNorm1d eps
NORM_EPS = 1e-12   # F.normalize eps
PDIST_EPS = 1e-6   # F.pairwise_distance eps (added to the difference)


# ----------------------------------------------------------------------------
# Fused kernel: projector(y1) + projector(y2) + SACLR loss + s_inv update
# (single_s=False, distributed=False)
# ----------------------------------------------------------------------------
def _saclr1_fused_kernel(y1_ref, y2_ref, w1_ref, g1_ref, b1_ref,
                         w2_ref, g2_ref, b2_ref, w3_ref, b3_ref, sinv_ref,
                         loss_ref, sinv_new_ref, *, temp, alpha, rho, n_total):
    B = y1_ref.shape[0]

    w1, w2, w3 = w1_ref[...], w2_ref[...], w3_ref[...]   # bf16 (cast host-side)
    g1, b1 = g1_ref[...], b1_ref[...]
    g2, b2 = g2_ref[...], b2_ref[...]
    b3 = b3_ref[...]

    def bn_relu_per_view(h, g, b):
        # training-mode BN, biased variance, *per-view* statistics (torch runs
        # the projector twice); slice the stacked (2B, D) activations.
        def bn(hv):
            mu = jnp.mean(hv, axis=0, keepdims=True)
            c = hv - mu
            var = jnp.mean(c * c, axis=0, keepdims=True)
            return jnp.maximum(c * lax.rsqrt(var + BN_EPS) * g + b, 0.0)
        return jnp.concatenate([bn(h[:B]), bn(h[B:])], axis=0)

    # ---- view-concat projector: one M=2B matmul per Linear -----------------
    # (concat done in f32 so the sublane stacking stays (8,128)-tile aligned;
    #  matmul operands bf16 on the MXU, accumulate + elementwise in f32)
    xa = y1_ref[...].astype(jnp.float32)
    xb = y2_ref[...].astype(jnp.float32)
    x = jnp.concatenate([xa, xb], axis=0).astype(jnp.bfloat16)      # (2B, D0)

    h = jnp.dot(x, w1, preferred_element_type=jnp.float32)
    h = bn_relu_per_view(h, g1, b1)
    h = jnp.dot(h.astype(jnp.bfloat16), w2, preferred_element_type=jnp.float32)
    h = bn_relu_per_view(h, g2, b2)
    h = jnp.dot(h.astype(jnp.bfloat16), w3, preferred_element_type=jnp.float32) + b3

    # F.normalize(h, dim=1, p=2): h / max(||h||, eps)
    nrm2 = jnp.sum(h * h, axis=1, keepdims=True)
    f = h * lax.rsqrt(jnp.maximum(nrm2, NORM_EPS * NORM_EPS))
    fa, fb = f[:B], f[B:]
    D = fa.shape[1]

    # ---- distances: the whole tail stays in (B,1) sublane orientation ------
    # (no (B,B) masks, no transposes; s_inv comes in / goes out as a column)
    # F.pairwise_distance adds eps to the ordered difference:
    #   d2(a,b) = sum(diff+e)^2 = sum diff^2 + 2e*sum diff + D*e^2
    #   d2(b,a) flips the sign of the cross term -> one square+reduce for both.
    diff = fa - fb
    s2 = jnp.sum(diff * diff, axis=1, keepdims=True)    # (B, 1)
    s1 = jnp.sum(diff, axis=1, keepdims=True)
    eps_term = D * PDIST_EPS * PDIST_EPS
    d2_ab = s2 + (2.0 * PDIST_EPS) * s1 + eps_term
    d2_ba = s2 - (2.0 * PDIST_EPS) * s1 + eps_term

    # neg_idxs = roll(arange(B), -1): partner (i+1) mod B (XLU slot).
    fb_roll = pltpu.roll(fb, shift=B - 1, axis=0)
    fa_roll = pltpu.roll(fa, shift=B - 1, axis=0)
    d2_ra = jnp.sum((fa - fb_roll + PDIST_EPS) ** 2, axis=1, keepdims=True)
    d2_rb = jnp.sum((fb - fa_roll + PDIST_EPS) ** 2, axis=1, keepdims=True)

    inv_2t2 = 1.0 / (2.0 * temp * temp)
    n_sq = n_total * n_total

    # attractive term directly from d2 (== -log(exp(-d2/(2 t^2))) without the
    # exp->log round trip / underflow hazard)
    attr_a = d2_ab * inv_2t2
    attr_b = d2_ba * inv_2t2
    q_attr_a = jnp.exp(-attr_a)
    q_attr_b = jnp.exp(-attr_b)
    q_rep_a = jnp.exp(-d2_ra * inv_2t2)
    q_rep_b = jnp.exp(-d2_rb * inv_2t2)

    sinv = sinv_ref[...]                        # (B, 1) = s_inv[feats_idx]
    z_hat = sinv * (1.0 / n_sq)
    inv_z = pl.reciprocal(z_hat, approx=True)   # EUP slot (free next to VALU)
    rep_a = q_rep_a * inv_z
    rep_b = q_rep_b * inv_z

    loss_ref[0, 0] = 0.5 * (jnp.mean(attr_a) + jnp.mean(rep_a)
                            + jnp.mean(attr_b) + jnp.mean(rep_b))

    xi_a = alpha * q_attr_a + (1.0 - alpha) * q_rep_a
    xi_b = alpha * q_attr_b + (1.0 - alpha) * q_rep_b
    s_a = rho * sinv + (1.0 - rho) * n_sq * xi_a
    s_b = rho * sinv + (1.0 - rho) * n_sq * xi_b
    sinv_new_ref[...] = 0.5 * (s_a + s_b)


def saclr1_step(y1, y2, sinv_col, params, *, temp, alpha, rho, n_total):
    """One fused SACLR1 step: projector on both views + loss + s_inv update."""
    B, D0 = y1.shape
    D1 = params["w1"].shape[1]
    D2 = params["w2"].shape[1]
    D3 = params["w3"].shape[1]
    kernel = functools.partial(_saclr1_fused_kernel, temp=temp, alpha=alpha,
                               rho=rho, n_total=n_total)
    args = (y1.astype(jnp.bfloat16), y2.astype(jnp.bfloat16),   # bf16 DMA
            params["w1"].astype(jnp.bfloat16), params["g1"], params["b1"],
            params["w2"].astype(jnp.bfloat16), params["g2"], params["b2"],
            params["w3"].astype(jnp.bfloat16), params["b3"],
            sinv_col)
    # Everything is small and 2-D: whole-array blocks, one grid step.
    # TODO(synk): real batch/contraction grid for production shapes (see top).
    in_specs = [pl.BlockSpec(a.shape, lambda i: (0, 0)) for a in args]

    flops = 2 * (2 * B) * (D0 * D1 + D1 * D2 + D2 * D3)
    transcendentals = 2 * (D1 + D2) + 7 * B
    bytes_accessed = (sum(int(a.size) * a.dtype.itemsize for a in args)
                      + B * 4 + 4)

    loss, sinv_new = pl.pallas_call(
        kernel,
        grid=(1,),
        in_specs=in_specs,
        out_specs=[pl.BlockSpec(memory_space=pltpu.MemorySpace.SMEM),
                   pl.BlockSpec((B, 1), lambda i: (0, 0))],
        out_shape=[jax.ShapeDtypeStruct((1, 1), jnp.float32),
                   jax.ShapeDtypeStruct((B, 1), jnp.float32)],
        compiler_params=pltpu.CompilerParams(
            dimension_semantics=("arbitrary",),
            vmem_limit_bytes=32 * 1024 * 1024),   # re-derive for v7x (64 MiB)
        cost_estimate=pl.CostEstimate(flops=flops,
                                      transcendentals=transcendentals,
                                      bytes_accessed=bytes_accessed),
    )(*args)
    return loss[0, 0], sinv_new[:, 0]


# ----------------------------------------------------------------------------
# Full forward (distributed=False, single_s=False)
# ----------------------------------------------------------------------------
def saclr1_forward(params, s_inv, y1_feats, y2_feats, feats_idx, *,
                   temp, alpha, rho, n_total):
    B = y1_feats.shape[0]
    sinv_col = jnp.take(s_inv, feats_idx).reshape(B, 1)     # O(B) gather
    loss, sinv_new = saclr1_step(y1_feats, y2_feats, sinv_col, params,
                                 temp=temp, alpha=alpha, rho=rho,
                                 n_total=n_total)
    # s_inv is donated at the jit boundary (see __main__), so this scatter is
    # an in-place O(B) update, not an O(N) copy of the whole buffer.
    s_inv_updated = s_inv.at[feats_idx].set(sinv_new)
    return loss, s_inv_updated


# ----------------------------------------------------------------------------
# Pure-JAX reference (same math; matmuls in bf16 like the kernel) for a check
# ----------------------------------------------------------------------------
def _reference(params, s_inv, y1, y2, feats_idx, temp, alpha, rho, n_total):
    def mm(a, b):   # mirror the kernel's bf16-operand / f32-accumulate matmul
        return jnp.dot(a.astype(jnp.bfloat16), b.astype(jnp.bfloat16),
                       preferred_element_type=jnp.float32)

    def proj(x):
        h = mm(x, params["w1"])
        mu = h.mean(0); var = ((h - mu) ** 2).mean(0)
        h = (h - mu) / jnp.sqrt(var + BN_EPS) * params["g1"] + params["b1"]
        h = jnp.maximum(h, 0.0)
        h = mm(h, params["w2"])
        mu = h.mean(0); var = ((h - mu) ** 2).mean(0)
        h = (h - mu) / jnp.sqrt(var + BN_EPS) * params["g2"] + params["b2"]
        h = jnp.maximum(h, 0.0)
        h = mm(h, params["w3"]) + params["b3"]
        n = jnp.sqrt(jnp.sum(h * h, axis=1, keepdims=True))
        return h / jnp.maximum(n, NORM_EPS)

    fa, fb = proj(y1), proj(y2)
    inv_2t2 = 1.0 / (2.0 * temp * temp)
    n_sq = n_total * n_total
    qa = jnp.exp(-jnp.sum((fa - fb + PDIST_EPS) ** 2, 1) * inv_2t2)
    qb = jnp.exp(-jnp.sum((fb - fa + PDIST_EPS) ** 2, 1) * inv_2t2)
    fbr, far = jnp.roll(fb, -1, 0), jnp.roll(fa, -1, 0)
    qra = jnp.exp(-jnp.sum((fa - fbr + PDIST_EPS) ** 2, 1) * inv_2t2)
    qrb = jnp.exp(-jnp.sum((fb - far + PDIST_EPS) ** 2, 1) * inv_2t2)
    sg = s_inv[feats_idx]
    z = sg / n_sq
    loss = ((-jnp.log(qa)).mean() + (qra / z).mean()
            + (-jnp.log(qb)).mean() + (qrb / z).mean()) / 2.0
    xa = alpha * qa + (1 - alpha) * qra
    xb = alpha * qb + (1 - alpha) * qrb
    sa = rho * sg + (1 - rho) * n_sq * xa
    sb = rho * sg + (1 - rho) * n_sq * xb
    return loss, s_inv.at[feats_idx].set((sa + sb) / 2.0)


if __name__ == "__main__":
    # small, shape-consistent config: backbone feature dim 32, projector "64-64-32"
    B, D0, D1, D2, D3 = 8, 32, 64, 64, 32
    N_DATA = 64                      # args.N (dataset size)
    TEMP, RHO, ALPHA, S_INIT = 0.5, 0.99, 0.5, 1.0

    key = jax.random.PRNGKey(0)
    ks = jax.random.split(key, 10)
    params = {
        "w1": jax.random.normal(ks[0], (D0, D1), jnp.float32) / jnp.sqrt(D0),
        "g1": 1.0 + 0.1 * jax.random.normal(ks[1], (1, D1), jnp.float32),
        "b1": 0.1 * jax.random.normal(ks[2], (1, D1), jnp.float32),
        "w2": jax.random.normal(ks[3], (D1, D2), jnp.float32) / jnp.sqrt(D1),
        "g2": 1.0 + 0.1 * jax.random.normal(ks[4], (1, D2), jnp.float32),
        "b2": 0.1 * jax.random.normal(ks[5], (1, D2), jnp.float32),
        "w3": jax.random.normal(ks[6], (D2, D3), jnp.float32) / jnp.sqrt(D2),
        "b3": 0.1 * jax.random.normal(ks[7], (1, D3), jnp.float32),
    }
    s_inv = jnp.full((N_DATA,), 1.0 / S_INIT, jnp.float32)   # register_buffer

    # y1 / y2: backbone(y) outputs (see layout note above)
    y1 = jax.random.normal(ks[8], (B, D0), jnp.float32)
    y2 = jax.random.normal(ks[9], (B, D0), jnp.float32)
    feats_idx = (jnp.arange(B, dtype=jnp.int32) * 3) % N_DATA   # unique indices

    # plain-JAX reference first (s_inv's buffer is donated to the jit below)
    ref_loss, ref_s = _reference(params, s_inv, y1, y2, feats_idx,
                                 TEMP, ALPHA, RHO, float(N_DATA))
    jax.block_until_ready((ref_loss, ref_s))

    fwd = jax.jit(functools.partial(saclr1_forward, temp=TEMP, alpha=ALPHA,
                                    rho=RHO, n_total=float(N_DATA)),
                  donate_argnums=(1,))        # in-place O(B) s_inv scatter
    loss, s_inv_new = fwd(params, s_inv, y1, y2, feats_idx)
    jax.block_until_ready((loss, s_inv_new))

    assert jnp.allclose(loss, ref_loss, rtol=1e-2, atol=1e-2), (loss, ref_loss)
    assert jnp.allclose(s_inv_new, ref_s, rtol=1e-2, atol=1e-2)

    print("KERNEL_OK")
</pallas_src>

<mosaic_0001>
module attributes {stable_mosaic.version = 11 : i64} {
  func.func @_saclr1_fused_kernel(%arg0: i32, %arg1: memref<8x32xbf16, #tpu.memory_space<vmem>>, %arg2: memref<8x32xbf16, #tpu.memory_space<vmem>>, %arg3: memref<32x64xbf16, #tpu.memory_space<vmem>>, %arg4: memref<1x64xf32, #tpu.memory_space<vmem>>, %arg5: memref<1x64xf32, #tpu.memory_space<vmem>>, %arg6: memref<64x64xbf16, #tpu.memory_space<vmem>>, %arg7: memref<1x64xf32, #tpu.memory_space<vmem>>, %arg8: memref<1x64xf32, #tpu.memory_space<vmem>>, %arg9: memref<64x32xbf16, #tpu.memory_space<vmem>>, %arg10: memref<1x32xf32, #tpu.memory_space<vmem>>, %arg11: memref<8x1xf32, #tpu.memory_space<vmem>>, %arg12: memref<1x1xf32, #tpu.memory_space<smem>>, %arg13: memref<8x1xf32, #tpu.memory_space<vmem>>) attributes {dimension_semantics = [#tpu.dimension_semantics<arbitrary>], iteration_bounds = array<i64: 1>, scalar_prefetch = 0 : i64, scratch_operands = 0 : i64, tpu.core_type = #tpu.core_type<tc>, window_params = [{pipeline_mode = #tpu.pipeline_mode<synchronous>, transform_indices = @transform_0, window_bounds = array<i64: 8, 32>}, {pipeline_mode = #tpu.pipeline_mode<synchronous>, transform_indices = @transform_1, window_bounds = array<i64: 8, 32>}, {pipeline_mode = #tpu.pipeline_mode<synchronous>, transform_indices = @transform_2, window_bounds = array<i64: 32, 64>}, {pipeline_mode = #tpu.pipeline_mode<synchronous>, transform_indices = @transform_3, window_bounds = array<i64: 1, 64>}, {pipeline_mode = #tpu.pipeline_mode<synchronous>, transform_indices = @transform_4, window_bounds = array<i64: 1, 64>}, {pipeline_mode = #tpu.pipeline_mode<synchronous>, transform_indices = @transform_5, window_bounds = array<i64: 64, 64>}, {pipeline_mode = #tpu.pipeline_mode<synchronous>, transform_indices = @transform_6, window_bounds = array<i64: 1, 64>}, {pipeline_mode = #tpu.pipeline_mode<synchronous>, transform_indices = @transform_7, window_bounds = array<i64: 1, 64>}, {pipeline_mode = #tpu.pipeline_mode<synchronous>, transform_indices = @transform_8, window_bounds = array<i64: 64, 32>}, {pipeline_mode = #tpu.pipeline_mode<synchronous>, transform_indices = @transform_9, window_bounds = array<i64: 1, 32>}, {pipeline_mode = #tpu.pipeline_mode<synchronous>, transform_indices = @transform_10, window_bounds = array<i64: 8, 1>}, {transform_indices = @transform_11, window_bounds = array<i64: 1, 1>}, {pipeline_mode = #tpu.pipeline_mode<synchronous>, transform_indices = @transform_12, window_bounds = array<i64: 8, 1>}]} {
    %c0 = arith.constant 0 : index
    %c0_0 = arith.constant 0 : index
    %0 = vector.load %arg3[%c0, %c0_0] : memref<32x64xbf16, #tpu.memory_space<vmem>>, vector<32x64xbf16>
    %c0_1 = arith.constant 0 : index
    %c0_2 = arith.constant 0 : index
    %1 = vector.load %arg6[%c0_1, %c0_2] : memref<64x64xbf16, #tpu.memory_space<vmem>>, vector<64x64xbf16>
    %c0_3 = arith.constant 0 : index
    %c0_4 = arith.constant 0 : index
    %2 = vector.load %arg9[%c0_3, %c0_4] : memref<64x32xbf16, #tpu.memory_space<vmem>>, vector<64x32xbf16>
    %c0_5 = arith.constant 0 : index
    %c0_6 = arith.constant 0 : index
    %3 = vector.load %arg4[%c0_5, %c0_6] : memref<1x64xf32, #tpu.memory_space<vmem>>, vector<1x64xf32>
    %c0_7 = arith.constant 0 : index
    %c0_8 = arith.constant 0 : index
    %4 = vector.load %arg5[%c0_7, %c0_8] : memref<1x64xf32, #tpu.memory_space<vmem>>, vector<1x64xf32>
    %c0_9 = arith.constant 0 : index
    %c0_10 = arith.constant 0 : index
    %5 = vector.load %arg7[%c0_9, %c0_10] : memref<1x64xf32, #tpu.memory_space<vmem>>, vector<1x64xf32>
    %c0_11 = arith.constant 0 : index
    %c0_12 = arith.constant 0 : index
    %6 = vector.load %arg8[%c0_11, %c0_12] : memref<1x64xf32, #tpu.memory_space<vmem>>, vector<1x64xf32>
    %c0_13 = arith.constant 0 : index
    %c0_14 = arith.constant 0 : index
    %7 = vector.load %arg10[%c0_13, %c0_14] : memref<1x32xf32, #tpu.memory_space<vmem>>, vector<1x32xf32>
    %c0_15 = arith.constant 0 : index
    %c0_16 = arith.constant 0 : index
    %8 = vector.load %arg1[%c0_15, %c0_16] : memref<8x32xbf16, #tpu.memory_space<vmem>>, vector<8x32xbf16>
    %9 = arith.extf %8 : vector<8x32xbf16> to vector<8x32xf32>
    %c0_17 = arith.constant 0 : index
    %c0_18 = arith.constant 0 : index
    %10 = vector.load %arg2[%c0_17, %c0_18] : memref<8x32xbf16, #tpu.memory_space<vmem>>, vector<8x32xbf16>
    %11 = arith.extf %10 : vector<8x32xbf16> to vector<8x32xf32>
    %12 = tpu.concatenate %9, %11 in 0 : vector<8x32xf32>, vector<8x32xf32> -> vector<16x32xf32>
    %13 = arith.truncf %12 : vector<16x32xf32> to vector<16x32xbf16>
    %cst = arith.constant dense<0.000000e+00> : vector<16x64xf32>
    %14 = tpu.matmul %13, %0, %cst {dimension_numbers = #tpu.dot_dimension_numbers<[1], [0], [0], [1], [0, 0, 1, 1], [], []>} : vector<16x32xbf16>, vector<32x64xbf16>, vector<16x64xf32> -> vector<16x64xf32>
    %15 = vector.extract_strided_slice %14 {offsets = [0, 0], sizes = [8, 64], strides = [1, 1]} : vector<16x64xf32> to vector<8x64xf32>
    %cst_19 = arith.constant dense<0.000000e+00> : vector<64xf32>
    %16 = vector.multi_reduction <add>, %15, %cst_19 [0] : vector<8x64xf32> to vector<64xf32>
    %17 = vector.shape_cast %16 : vector<64xf32> to vector<1x64xf32>
    %cst_20 = arith.constant 8.000000e+00 : f32
    %18 = vector.broadcast %cst_20 : f32 to vector<1x64xf32>
    %19 = arith.divf %17, %18 : vector<1x64xf32>
    %20 = vector.broadcast %19 : vector<1x64xf32> to vector<8x64xf32>
    %21 = arith.subf %15, %20 : vector<8x64xf32>
    %22 = arith.mulf %21, %21 : vector<8x64xf32>
    %cst_21 = arith.constant dense<0.000000e+00> : vector<64xf32>
    %23 = vector.multi_reduction <add>, %22, %cst_21 [0] : vector<8x64xf32> to vector<64xf32>
    %24 = vector.shape_cast %23 : vector<64xf32> to vector<1x64xf32>
    %cst_22 = arith.constant 8.000000e+00 : f32
    %25 = vector.broadcast %cst_22 : f32 to vector<1x64xf32>
    %26 = arith.divf %24, %25 : vector<1x64xf32>
    %cst_23 = arith.constant 9.99999974E-6 : f32
    %27 = vector.broadcast %cst_23 : f32 to vector<1x64xf32>
    %28 = arith.addf %26, %27 : vector<1x64xf32>
    %29 = math.rsqrt %28 : vector<1x64xf32>
    %30 = vector.broadcast %29 : vector<1x64xf32> to vector<8x64xf32>
    %31 = arith.mulf %21, %30 : vector<8x64xf32>
    %32 = vector.broadcast %3 : vector<1x64xf32> to vector<8x64xf32>
    %33 = arith.mulf %31, %32 : vector<8x64xf32>
    %34 = vector.broadcast %4 : vector<1x64xf32> to vector<8x64xf32>
    %35 = arith.addf %33, %34 : vector<8x64xf32>
    %cst_24 = arith.constant 0.000000e+00 : f32
    %36 = vector.broadcast %cst_24 : f32 to vector<8x64xf32>
    %37 = arith.maximumf %35, %36 : vector<8x64xf32>
    %38 = vector.extract_strided_slice %14 {offsets = [8, 0], sizes = [8, 64], strides = [1, 1]} : vector<16x64xf32> to vector<8x64xf32>
    %cst_25 = arith.constant dense<0.000000e+00> : vector<64xf32>
    %39 = vector.multi_reduction <add>, %38, %cst_25 [0] : vector<8x64xf32> to vector<64xf32>
    %40 = vector.shape_cast %39 : vector<64xf32> to vector<1x64xf32>
    %cst_26 = arith.constant 8.000000e+00 : f32
    %41 = vector.broadcast %cst_26 : f32 to vector<1x64xf32>
    %42 = arith.divf %40, %41 : vector<1x64xf32>
    %43 = vector.broadcast %42 : vector<1x64xf32> to vector<8x64xf32>
    %44 = arith.subf %38, %43 : vector<8x64xf32>
    %45 = arith.mulf %44, %44 : vector<8x64xf32>
    %cst_27 = arith.constant dense<0.000000e+00> : vector<64xf32>
    %46 = vector.multi_reduction <add>, %45, %cst_27 [0] : vector<8x64xf32> to vector<64xf32>
    %47 = vector.shape_cast %46 : vector<64xf32> to vector<1x64xf32>
    %cst_28 = arith.constant 8.000000e+00 : f32
    %48 = vector.broadcast %cst_28 : f32 to vector<1x64xf32>
    %49 = arith.divf %47, %48 : vector<1x64xf32>
    %cst_29 = arith.constant 9.99999974E-6 : f32
    %50 = vector.broadcast %cst_29 : f32 to vector<1x64xf32>
    %51 = arith.addf %49, %50 : vector<1x64xf32>
    %52 = math.rsqrt %51 : vector<1x64xf32>
    %53 = vector.broadcast %52 : vector<1x64xf32> to vector<8x64xf32>
    %54 = arith.mulf %44, %53 : vector<8x64xf32>
    %55 = vector.broadcast %3 : vector<1x64xf32> to vector<8x64xf32>
    %56 = arith.mulf %54, %55 : vector<8x64xf32>
    %57 = vector.broadcast %4 : vector<1x64xf32> to vector<8x64xf32>
    %58 = arith.addf %56, %57 : vector<8x64xf32>
    %cst_30 = arith.constant 0.000000e+00 : f32
    %59 = vector.broadcast %cst_30 : f32 to vector<8x64xf32>
    %60 = arith.maximumf %58, %59 : vector<8x64xf32>
    %61 = tpu.concatenate %37, %60 in 0 : vector<8x64xf32>, vector<8x64xf32> -> vector<16x64xf32>
    %62 = arith.truncf %61 : vector<16x64xf32> to vector<16x64xbf16>
    %cst_31 = arith.constant dense<0.000000e+00> : vector<16x64xf32>
    %63 = tpu.matmul %62, %1, %cst_31 {dimension_numbers = #tpu.dot_dimension_numbers<[1], [0], [0], [1], [0, 0, 1, 1], [], []>} : vector<16x64xbf16>, vector<64x64xbf16>, vector<16x64xf32> -> vector<16x64xf32>
    %64 = vector.extract_strided_slice %63 {offsets = [0, 0], sizes = [8, 64], strides = [1, 1]} : vector<16x64xf32> to vector<8x64xf32>
    %cst_32 = arith.constant dense<0.000000e+00> : vector<64xf32>
    %65 = vector.multi_reduction <add>, %64, %cst_32 [0] : vector<8x64xf32> to vector<64xf32>
    %66 = vector.shape_cast %65 : vector<64xf32> to vector<1x64xf32>
    %cst_33 = arith.constant 8.000000e+00 : f32
    %67 = vector.broadcast %cst_33 : f32 to vector<1x64xf32>
    %68 = arith.divf %66, %67 : vector<1x64xf32>
    %69 = vector.broadcast %68 : vector<1x64xf32> to vector<8x64xf32>
    %70 = arith.subf %64, %69 : vector<8x64xf32>
    %71 = arith.mulf %70, %70 : vector<8x64xf32>
    %cst_34 = arith.constant dense<0.000000e+00> : vector<64xf32>
    %72 = vector.multi_reduction <add>, %71, %cst_34 [0] : vector<8x64xf32> to vector<64xf32>
    %73 = vector.shape_cast %72 : vector<64xf32> to vector<1x64xf32>
    %cst_35 = arith.constant 8.000000e+00 : f32
    %74 = vector.broadcast %cst_35 : f32 to vector<1x64xf32>
    %75 = arith.divf %73, %74 : vector<1x64xf32>
    %cst_36 = arith.constant 9.99999974E-6 : f32
    %76 = vector.broadcast %cst_36 : f32 to vector<1x64xf32>
    %77 = arith.addf %75, %76 : vector<1x64xf32>
    %78 = math.rsqrt %77 : vector<1x64xf32>
    %79 = vector.broadcast %78 : vector<1x64xf32> to vector<8x64xf32>
    %80 = arith.mulf %70, %79 : vector<8x64xf32>
    %81 = vector.broadcast %5 : vector<1x64xf32> to vector<8x64xf32>
    %82 = arith.mulf %80, %81 : vector<8x64xf32>
    %83 = vector.broadcast %6 : vector<1x64xf32> to vector<8x64xf32>
    %84 = arith.addf %82, %83 : vector<8x64xf32>
    %cst_37 = arith.constant 0.000000e+00 : f32
    %85 = vector.broadcast %cst_37 : f32 to vector<8x64xf32>
    %86 = arith.maximumf %84, %85 : vector<8x64xf32>
    %87 = vector.extract_strided_slice %63 {offsets = [8, 0], sizes = [8, 64], strides = [1, 1]} : vector<16x64xf32> to vector<8x64xf32>
    %cst_38 = arith.constant dense<0.000000e+00> : vector<64xf32>
    %88 = vector.multi_reduction <add>, %87, %cst_38 [0] : vector<8x64xf32> to vector<64xf32>
    %89 = vector.shape_cast %88 : vector<64xf32> to vector<1x64xf32>
    %cst_39 = arith.constant 8.000000e+00 : f32
    %90 = vector.broadcast %cst_39 : f32 to vector<1x64xf32>
    %91 = arith.divf %89, %90 : vector<1x64xf32>
    %92 = vector.broadcast %91 : vector<1x64xf32> to vector<8x64xf32>
    %93 = arith.subf %87, %92 : vector<8x64xf32>
    %94 = arith.mulf %93, %93 : vector<8x64xf32>
    %cst_40 = arith.constant dense<0.000000e+00> : vector<64xf32>
    %95 = vector.multi_reduction <add>, %94, %cst_40 [0] : vector<8x64xf32> to vector<64xf32>
    %96 = vector.shape_cast %95 : vector<64xf32> to vector<1x64xf32>
    %cst_41 = arith.constant 8.000000e+00 : f32
    %97 = vector.broadcast %cst_41 : f32 to vector<1x64xf32>
    %98 = arith.divf %96, %97 : vector<1x64xf32>
    %cst_42 = arith.constant 9.99999974E-6 : f32
    %99 = vector.broadcast %cst_42 : f32 to vector<1x64xf32>
    %100 = arith.addf %98, %99 : vector<1x64xf32>
    %101 = math.rsqrt %100 : vector<1x64xf32>
    %102 = vector.broadcast %101 : vector<1x64xf32> to vector<8x64xf32>
    %103 = arith.mulf %93, %102 : vector<8x64xf32>
    %104 = vector.broadcast %5 : vector<1x64xf32> to vector<8x64xf32>
    %105 = arith.mulf %103, %104 : vector<8x64xf32>
    %106 = vector.broadcast %6 : vector<1x64xf32> to vector<8x64xf32>
    %107 = arith.addf %105, %106 : vector<8x64xf32>
    %cst_43 = arith.constant 0.000000e+00 : f32
    %108 = vector.broadcast %cst_43 : f32 to vector<8x64xf32>
    %109 = arith.maximumf %107, %108 : vector<8x64xf32>
    %110 = tpu.concatenate %86, %109 in 0 : vector<8x64xf32>, vector<8x64xf32> -> vector<16x64xf32>
    %111 = arith.truncf %110 : vector<16x64xf32> to vector<16x64xbf16>
    %cst_44 = arith.constant dense<0.000000e+00> : vector<16x32xf32>
    %112 = tpu.matmul %111, %2, %cst_44 {dimension_numbers = #tpu.dot_dimension_numbers<[1], [0], [0], [1], [0, 0, 1, 1], [], []>} : vector<16x64xbf16>, vector<64x32xbf16>, vector<16x32xf32> -> vector<16x32xf32>
    %113 = vector.broadcast %7 : vector<1x32xf32> to vector<16x32xf32>
    %114 = arith.addf %112, %113 : vector<16x32xf32>
    %115 = arith.mulf %114, %114 : vector<16x32xf32>
    %cst_45 = arith.constant dense<0.000000e+00> : vector<16xf32>
    %116 = vector.multi_reduction <add>, %115, %cst_45 [1] : vector<16x32xf32> to vector<16xf32>
    %117 = vector.shape_cast %116 : vector<16xf32> to vector<16x1xf32>
    %cst_46 = arith.constant 1.000000e-24 : f32
    %118 = vector.broadcast %cst_46 : f32 to vector<16x1xf32>
    %119 = arith.maximumf %117, %118 : vector<16x1xf32>
    %120 = math.rsqrt %119 : vector<16x1xf32>
    %121 = vector.broadcast %120 : vector<16x1xf32> to vector<16x32xf32>
    %122 = arith.mulf %114, %121 : vector<16x32xf32>
    %123 = vector.extract_strided_slice %122 {offsets = [0, 0], sizes = [8, 32], strides = [1, 1]} : vector<16x32xf32> to vector<8x32xf32>
    %124 = vector.extract_strided_slice %122 {offsets = [8, 0], sizes = [8, 32], strides = [1, 1]} : vector<16x32xf32> to vector<8x32xf32>
    %125 = arith.subf %123, %124 : vector<8x32xf32>
    %126 = arith.mulf %125, %125 : vector<8x32xf32>
    %cst_47 = arith.constant dense<0.000000e+00> : vector<8xf32>
    %127 = vector.multi_reduction <add>, %126, %cst_47 [1] : vector<8x32xf32> to vector<8xf32>
    %128 = vector.shape_cast %127 : vector<8xf32> to vector<8x1xf32>
    %cst_48 = arith.constant dense<0.000000e+00> : vector<8xf32>
    %129 = vector.multi_reduction <add>, %125, %cst_48 [1] : vector<8x32xf32> to vector<8xf32>
    %130 = vector.shape_cast %129 : vector<8xf32> to vector<8x1xf32>
    %cst_49 = arith.constant 2.000000e-06 : f32
    %131 = vector.broadcast %cst_49 : f32 to vector<8x1xf32>
    %132 = arith.mulf %131, %130 : vector<8x1xf32>
    %133 = arith.addf %128, %132 : vector<8x1xf32>
    %cst_50 = arith.constant 3.200000e-11 : f32
    %134 = vector.broadcast %cst_50 : f32 to vector<8x1xf32>
    %135 = arith.addf %133, %134 : vector<8x1xf32>
    %cst_51 = arith.constant 2.000000e-06 : f32
    %136 = vector.broadcast %cst_51 : f32 to vector<8x1xf32>
    %137 = arith.mulf %136, %130 : vector<8x1xf32>
    %138 = arith.subf %128, %137 : vector<8x1xf32>
    %cst_52 = arith.constant 3.200000e-11 : f32
    %139 = vector.broadcast %cst_52 : f32 to vector<8x1xf32>
    %140 = arith.addf %138, %139 : vector<8x1xf32>
    %c7_i32 = arith.constant 7 : i32
    %141 = tpu.dynamic_rotate %124 by %c7_i32 dim 0 : vector<8x32xf32>, i32 -> vector<8x32xf32>
    %c7_i32_53 = arith.constant 7 : i32
    %142 = tpu.dynamic_rotate %123 by %c7_i32_53 dim 0 : vector<8x32xf32>, i32 -> vector<8x32xf32>
    %143 = arith.subf %123, %141 : vector<8x32xf32>
    %cst_54 = arith.constant 9.99999997E-7 : f32
    %144 = vector.broadcast %cst_54 : f32 to vector<8x32xf32>
    %145 = arith.addf %143, %144 : vector<8x32xf32>
    %146 = arith.mulf %145, %145 : vector<8x32xf32>
    %cst_55 = arith.constant dense<0.000000e+00> : vector<8xf32>
    %147 = vector.multi_reduction <add>, %146, %cst_55 [1] : vector<8x32xf32> to vector<8xf32>
    %148 = vector.shape_cast %147 : vector<8xf32> to vector<8x1xf32>
    %149 = arith.subf %124, %142 : vector<8x32xf32>
    %cst_56 = arith.constant 9.99999997E-7 : f32
    %150 = vector.broadcast %cst_56 : f32 to vector<8x32xf32>
    %151 = arith.addf %149, %150 : vector<8x32xf32>
    %152 = arith.mulf %151, %151 : vector<8x32xf32>
    %cst_57 = arith.constant dense<0.000000e+00> : vector<8xf32>
    %153 = vector.multi_reduction <add>, %152, %cst_57 [1] : vector<8x32xf32> to vector<8xf32>
    %154 = vector.shape_cast %153 : vector<8xf32> to vector<8x1xf32>
    %cst_58 = arith.constant 2.000000e+00 : f32
    %155 = vector.broadcast %cst_58 : f32 to vector<8x1xf32>
    %156 = arith.mulf %135, %155 : vector<8x1xf32>
    %cst_59 = arith.constant 2.000000e+00 : f32
    %157 = vector.broadcast %cst_59 : f32 to vector<8x1xf32>
    %158 = arith.mulf %140, %157 : vector<8x1xf32>
    %cst_60 = arith.constant 0.000000e+00 : f32
    %159 = vector.broadcast %cst_60 : f32 to vector<8x1xf32>
    %160 = arith.subf %159, %156 : vector<8x1xf32>
    %161 = math.exp %160 : vector<8x1xf32>
    %cst_61 = arith.constant 0.000000e+00 : f32
    %162 = vector.broadcast %cst_61 : f32 to vector<8x1xf32>
    %163 = arith.subf %162, %158 : vector<8x1xf32>
    %164 = math.exp %163 : vector<8x1xf32>
    %cst_62 = arith.constant 0.000000e+00 : f32
    %165 = vector.broadcast %cst_62 : f32 to vector<8x1xf32>
    %166 = arith.subf %165, %148 : vector<8x1xf32>
    %cst_63 = arith.constant 2.000000e+00 : f32
    %167 = vector.broadcast %cst_63 : f32 to vector<8x1xf32>
    %168 = arith.mulf %166, %167 : vector<8x1xf32>
    %169 = math.exp %168 : vector<8x1xf32>
    %cst_64 = arith.constant 0.000000e+00 : f32
    %170 = vector.broadcast %cst_64 : f32 to vector<8x1xf32>
    %171 = arith.subf %170, %154 : vector<8x1xf32>
    %cst_65 = arith.constant 2.000000e+00 : f32
    %172 = vector.broadcast %cst_65 : f32 to vector<8x1xf32>
    %173 = arith.mulf %171, %172 : vector<8x1xf32>
    %174 = math.exp %173 : vector<8x1xf32>
    %c0_66 = arith.constant 0 : index
    %c0_67 = arith.constant 0 : index
    %175 = vector.load %arg11[%c0_66, %c0_67] : memref<8x1xf32, #tpu.memory_space<vmem>>, vector<8x1xf32>
    %cst_68 = arith.constant 2.44140625E-4 : f32
    %176 = vector.broadcast %cst_68 : f32 to vector<8x1xf32>
    %177 = arith.mulf %175, %176 : vector<8x1xf32>
    %178 = tpu.reciprocal %177 {approx = true} : vector<8x1xf32> -> vector<8x1xf32>
    %179 = arith.mulf %169, %178 : vector<8x1xf32>
    %180 = arith.mulf %174, %178 : vector<8x1xf32>
    %181 = vector.shape_cast %156 : vector<8x1xf32> to vector<1x8x1xf32>
    %cst_69 = arith.constant dense<0.000000e+00> : vector<1xf32>
    %182 = vector.multi_reduction <add>, %181, %cst_69 [1, 2] : vector<1x8x1xf32> to vector<1xf32>
    %183 = vector.shape_cast %182 : vector<1xf32> to vector<1x1x1xf32>
    %184 = vector.extract %183[0, 0, 0] : f32 from vector<1x1x1xf32>
    %cst_70 = arith.constant 8.000000e+00 : f32
    %185 = arith.divf %184, %cst_70 : f32
    %186 = vector.shape_cast %179 : vector<8x1xf32> to vector<1x8x1xf32>
    %cst_71 = arith.constant dense<0.000000e+00> : vector<1xf32>
    %187 = vector.multi_reduction <add>, %186, %cst_71 [1, 2] : vector<1x8x1xf32> to vector<1xf32>
    %188 = vector.shape_cast %187 : vector<1xf32> to vector<1x1x1xf32>
    %189 = vector.extract %188[0, 0, 0] : f32 from vector<1x1x1xf32>
    %cst_72 = arith.constant 8.000000e+00 : f32
    %190 = arith.divf %189, %cst_72 : f32
    %191 = arith.addf %185, %190 : f32
    %192 = vector.shape_cast %158 : vector<8x1xf32> to vector<1x8x1xf32>
    %cst_73 = arith.constant dense<0.000000e+00> : vector<1xf32>
    %193 = vector.multi_reduction <add>, %192, %cst_73 [1, 2] : vector<1x8x1xf32> to vector<1xf32>
    %194 = vector.shape_cast %193 : vector<1xf32> to vector<1x1x1xf32>
    %195 = vector.extract %194[0, 0, 0] : f32 from vector<1x1x1xf32>
    %cst_74 = arith.constant 8.000000e+00 : f32
    %196 = arith.divf %195, %cst_74 : f32
    %197 = arith.addf %191, %196 : f32
    %198 = vector.shape_cast %180 : vector<8x1xf32> to vector<1x8x1xf32>
    %cst_75 = arith.constant dense<0.000000e+00> : vector<1xf32>
    %199 = vector.multi_reduction <add>, %198, %cst_75 [1, 2] : vector<1x8x1xf32> to vector<1xf32>
    %200 = vector.shape_cast %199 : vector<1xf32> to vector<1x1x1xf32>
    %201 = vector.extract %200[0, 0, 0] : f32 from vector<1x1x1xf32>
    %cst_76 = arith.constant 8.000000e+00 : f32
    %202 = arith.divf %201, %cst_76 : f32
    %203 = arith.addf %197, %202 : f32
    %cst_77 = arith.constant 5.000000e-01 : f32
    %204 = arith.mulf %cst_77, %203 : f32
    %c0_78 = arith.constant 0 : index
    %c0_79 = arith.constant 0 : index
    %205 = memref.load %arg12[%c0_78, %c0_79] : memref<1x1xf32, #tpu.memory_space<smem>>
    memref.store %204, %arg12[%c0_78, %c0_79] : memref<1x1xf32, #tpu.memory_space<smem>>
    %cst_80 = arith.constant 5.000000e-01 : f32
    %206 = vector.broadcast %cst_80 : f32 to vector<8x1xf32>
    %207 = arith.mulf %206, %161 : vector<8x1xf32>
    %cst_81 = arith.constant 5.000000e-01 : f32
    %208 = vector.broadcast %cst_81 : f32 to vector<8x1xf32>
    %209 = arith.mulf %208, %169 : vector<8x1xf32>
    %210 = arith.addf %207, %209 : vector<8x1xf32>
    %cst_82 = arith.constant 5.000000e-01 : f32
    %211 = vector.broadcast %cst_82 : f32 to vector<8x1xf32>
    %212 = arith.mulf %211, %164 : vector<8x1xf32>
    %cst_83 = arith.constant 5.000000e-01 : f32
    %213 = vector.broadcast %cst_83 : f32 to vector<8x1xf32>
    %214 = arith.mulf %213, %174 : vector<8x1xf32>
    %215 = arith.addf %212, %214 : vector<8x1xf32>
    %cst_84 = arith.constant 9.900000e-01 : f32
    %216 = vector.broadcast %cst_84 : f32 to vector<8x1xf32>
    %217 = arith.mulf %216, %175 : vector<8x1xf32>
    %cst_85 = arith.constant 4.096000e+01 : f32
    %218 = vector.broadcast %cst_85 : f32 to vector<8x1xf32>
    %219 = arith.mulf %218, %210 : vector<8x1xf32>
    %220 = arith.addf %217, %219 : vector<8x1xf32>
    %cst_86 = arith.constant 9.900000e-01 : f32
    %221 = vector.broadcast %cst_86 : f32 to vector<8x1xf32>
    %222 = arith.mulf %221, %175 : vector<8x1xf32>
    %cst_87 = arith.constant 4.096000e+01 : f32
    %223 = vector.broadcast %cst_87 : f32 to vector<8x1xf32>
    %224 = arith.mulf %223, %215 : vector<8x1xf32>
    %225 = arith.addf %222, %224 : vector<8x1xf32>
    %226 = arith.addf %220, %225 : vector<8x1xf32>
    %cst_88 = arith.constant 5.000000e-01 : f32
    %227 = vector.broadcast %cst_88 : f32 to vector<8x1xf32>
    %228 = arith.mulf %227, %226 : vector<8x1xf32>
    %c0_89 = arith.constant 0 : index
    %c0_90 = arith.constant 0 : index
    %229 = vector.load %arg13[%c0_89, %c0_90] : memref<8x1xf32, #tpu.memory_space<vmem>>, vector<8x1xf32>
    tpu.vector_store %arg13[%c0_89, %c0_90], %228 {strides = array<i32>} : memref<8x1xf32, #tpu.memory_space<vmem>>, vector<8x1xf32>,
    return
  }
  func.func @transform_0(%arg0: i32) -> (i32, i32) {
    %c0_i32 = arith.constant 0 : i32
    %c0_i32_0 = arith.constant 0 : i32
    %c0_i32_1 = arith.constant 0 : i32
    return %c0_i32, %c0_i32_0 : i32, i32
  }
  func.func @transform_1(%arg0: i32) -> (i32, i32) {
    %c0_i32 = arith.constant 0 : i32
    %c0_i32_0 = arith.constant 0 : i32
    %c0_i32_1 = arith.constant 0 : i32
    return %c0_i32, %c0_i32_0 : i32, i32
  }
  func.func @transform_2(%arg0: i32) -> (i32, i32) {
    %c0_i32 = arith.constant 0 : i32
    %c0_i32_0 = arith.constant 0 : i32
    %c0_i32_1 = arith.constant 0 : i32
    return %c0_i32, %c0_i32_0 : i32, i32
  }
  func.func @transform_3(%arg0: i32) -> (i32, i32) {
    %c0_i32 = arith.constant 0 : i32
    %c0_i32_0 = arith.constant 0 : i32
    %c0_i32_1 = arith.constant 0 : i32
    return %c0_i32, %c0_i32_0 : i32, i32
  }
  func.func @transform_4(%arg0: i32) -> (i32, i32) {
    %c0_i32 = arith.constant 0 : i32
    %c0_i32_0 = arith.constant 0 : i32
    %c0_i32_1 = arith.constant 0 : i32
    return %c0_i32, %c0_i32_0 : i32, i32
  }
  func.func @transform_5(%arg0: i32) -> (i32, i32) {
    %c0_i32 = arith.constant 0 : i32
    %c0_i32_0 = arith.constant 0 : i32
    %c0_i32_1 = arith.constant 0 : i32
    return %c0_i32, %c0_i32_0 : i32, i32
  }
  func.func @transform_6(%arg0: i32) -> (i32, i32) {
    %c0_i32 = arith.constant 0 : i32
    %c0_i32_0 = arith.constant 0 : i32
    %c0_i32_1 = arith.constant 0 : i32
    return %c0_i32, %c0_i32_0 : i32, i32
  }
  func.func @transform_7(%arg0: i32) -> (i32, i32) {
    %c0_i32 = arith.constant 0 : i32
    %c0_i32_0 = arith.constant 0 : i32
    %c0_i32_1 = arith.constant 0 : i32
    return %c0_i32, %c0_i32_0 : i32, i32
  }
  func.func @transform_8(%arg0: i32) -> (i32, i32) {
    %c0_i32 = arith.constant 0 : i32
    %c0_i32_0 = arith.constant 0 : i32
    %c0_i32_1 = arith.constant 0 : i32
    return %c0_i32, %c0_i32_0 : i32, i32
  }
  func.func @transform_9(%arg0: i32) -> (i32, i32) {
    %c0_i32 = arith.constant 0 : i32
    %c0_i32_0 = arith.constant 0 : i32
    %c0_i32_1 = arith.constant 0 : i32
    return %c0_i32, %c0_i32_0 : i32, i32
  }
  func.func @transform_10(%arg0: i32) -> (i32, i32) {
    %c0_i32 = arith.constant 0 : i32
    %c0_i32_0 = arith.constant 0 : i32
    %c0_i32_1 = arith.constant 0 : i32
    return %c0_i32, %c0_i32_0 : i32, i32
  }
  func.func @transform_11(%arg0: i32) -> (i32, i32) {
    %c0_i32 = arith.constant 0 : i32
    %c0_i32_0 = arith.constant 0 : i32
    %c0_i32_1 = arith.constant 0 : i32
    return %c0_i32, %c0_i32_0 : i32, i32
  }
  func.func @transform_12(%arg0: i32) -> (i32, i32) {
    %c0_i32 = arith.constant 0 : i32
    %c0_i32_0 = arith.constant 0 : i32
    %c0_i32_1 = arith.constant 0 : i32
    return %c0_i32, %c0_i32_0 : i32, i32
  }
}

</mosaic_0001>

<bundles_post_ra>
// kernel: saclr1_forward.1
= control target key start
LH: loop header
LB: loop body
LE: loop exit
PB: predicated region body
PF: predicated region fallthrough
CT: control target
= control target key end

     0   :  { %s810_s0 = inlined_call_operand.vmem [shape: bf16[8,32], index: 0, kind: input, shape index: {}]   ;;  %s811_s1 = inlined_call_operand.vmem [shape: bf16[8,32], index: 1, kind: input, shape index: {}]   ;;  %s812_s2 = inlined_call_operand.vmem [shape: bf16[32,64], index: 2, kind: input, shape index: {}]   ;;  %s813_s3 = inlined_call_operand.vmem [shape: f32[1,64], index: 3, kind: input, shape index: {}]   ;;  %s814_s4 = inlined_call_operand.vmem [shape: f32[1,64], index: 4, kind: input, shape index: {}]   ;;  %s815_s5 = inlined_call_operand.vmem [shape: bf16[64,64], index: 5, kind: input, shape index: {}]   ;;  %s816_s6 = inlined_call_operand.vmem [shape: f32[1,64], index: 6, kind: input, shape index: {}]   ;;  %s817_s7 = inlined_call_operand.vmem [shape: f32[1,64], index: 7, kind: input, shape index: {}]   ;;  %s818_s8 = inlined_call_operand.vmem [shape: bf16[64,32], index: 8, kind: input, shape index: {}]   ;;  %s819_s9 = inlined_call_operand.vmem [shape: f32[1,32], index: 9, kind: input, shape index: {}]   ;;  %s820_s10 = inlined_call_operand.vmem [shape: f32[8,1], index: 10, kind: input, shape index: {}]   ;;  %s821_s11 = inlined_call_operand.hbm [shape: f32[1,1], index: 11, kind: output, shape index: {0}]   ;;  %s822_s12 = inlined_call_operand.vmem [shape: f32[8,1], index: 12, kind: output, shape index: {1}]  }
   0x1   :  { %v585_v0 = vld [vmem:[%s812_s2 + $0x8] sm:$0xff]  ;;  %v584_v1 = vld [vmem:[%s812_s2] sm:$0xff] }
   0x2   :  { %v539_v2 = vld [vmem:[%s810_s0] sm:$0xf]  ;;  %94 = vmatpush.bf16.msra.mxu0 %v585_v0 }
   0x3   :  { %v594_v3 = vld [vmem:[%s811_s1 - $0x4] sm:$0xf0] }
   0x4   :  { %18 = vsyncpa [#allocation3], 0  ;;  %v540_v4 = vor.u32 %v594_v3, %v539_v2  ;;  %vm84_vm0 = vcmask 261120   ;;  %v650_v5 = vmov 8.0   ;;  %vm102_vm1 = vcmask 523264   ;;  %v589_v36 = vld [vmem:[%s815_s5 + $0x18] sm:$0xff] }
   0x5   :  { %612 = vrcp.f32 %v650_v5  ;;  %214 = vmatpush.bf16.msra.mxu1 %v589_v36  ;;  %v588_v41 = vld [vmem:[%s815_s5 + $0x10] sm:$0xff]  ;;  %v587_v46 = vld [vmem:[%s815_s5 + $0x8] sm:$0xff]  ;;  %v586_v49 = vld [vmem:[%s815_s5] sm:$0xff]  ;;  %s651_s21 = smov [#allocation2]  }
   0x6   :  { %95 = vmatpush.bf16.msra.mxu0 %v584_v1 }
   0x9   :  { %549 = vmatmul.msk.bf16.vlgmr.msra.gmra.mxu0 %vm84_vm0, %v540_v4  ;;  %215 = vmatpush.bf16.msra.mxu1 %v588_v41  ;;  %v607_v4 = vld [vmem:[%s813_s3] ss:$0 sm:$0xff] }
   0xb   :  { %v613_v6 = vpop.eup %612 }
   0xc   :  { %v111_v7 = vmul.f32 8.0, %v613_v6  ;;  %vm115_vm2 = vweird.f32 %v613_v6 }
   0xd   :  { %216 = vmatpush.bf16.msra.mxu1 %v587_v46 }
   0xe   :  { %v112_v8 = vsub.f32 1.0, %v111_v7 }
  0x10   :  { %v113_v12 = vmul.f32 %v613_v6, %v112_v8  ;;  %v608_v8 = vld [vmem:[%s814_s4] ss:$0 sm:$0xff]  ;;  %s523_s4 = sshll.u32 %s821_s11, 4  ;;  %s524_s4 = int_to_ptr.hbm [resolvable:$true] %s523_s4 }
  0x11   :  { %217 = vmatpush.bf16.msra.mxu1 %v586_v49 }
  0x12   :  { %v114_v15 = vadd.f32 %v613_v6, %v113_v12 }
  0x14   :  { %v732_v21 = vsel %vm115_vm2, %v613_v6, %v114_v15 }
  0x86   :  { %v97_v9 = vpop.f32.mrf.mxu0 }
  0x87   :  { %v103_v10 = vsel %vm102_vm1, %v97_v9, 0.0 }
  0x88   :  { %v104_v11 = vrot.slane %v103_v10, 4 }
  0x8a   :  { %v105_v13 = vadd.f32 %v104_v11, %v103_v10 }
  0x8c   :  { %v106_v14 = vrot.slane %v105_v13, 2 }
  0x8e   :  { %v107_v16 = vadd.f32 %v106_v14, %v105_v13  ;;  %v99_v17 = vpop.f32.mrf.mxu0 }
  0x8f   :  { %v149_v18 = vsel %vm102_vm1, %v99_v17, 0.0 }
  0x90   :  { %v108_v19 = vrot.slane %v107_v16, 1  ;;  %v150_v20 = vrot.slane %v149_v18, 4 }
  0x92   :  { %v109_v22 = vadd.f32 %v108_v19, %v107_v16  ;;  %v151_v23 = vadd.f32 %v150_v20, %v149_v18 }
  0x94   :  { %v117_v24 = vmul.f32 %v732_v21, %v109_v22  ;;  %v152_v25 = vrot.slane %v151_v23, 2 }
  0x96   :  { %v118_v26 = vsub.f32 %v97_v9, %v117_v24  ;;  %v153_v27 = vadd.f32 %v152_v25, %v151_v23 }
  0x98   :  { %v119_v28 = vmul.f32 %v118_v26, %v118_v26  ;;  %v154_v29 = vrot.slane %v153_v27, 1 }
  0x9a   :  { %v120_v30 = vsel %vm102_vm1, %v119_v28, 0.0  ;;  %v155_v31 = vadd.f32 %v154_v29, %v153_v27 }
  0x9b   :  { %v121_v32 = vrot.slane %v120_v30, 4 }
  0x9c   :  { %v156_v33 = vmul.f32 %v155_v31, %v732_v21 }
  0x9d   :  { %v122_v34 = vadd.f32 %v121_v32, %v120_v30 }
  0x9e   :  { %v157_v35 = vsub.f32 %v99_v17, %v156_v33 }
  0x9f   :  { %v123_v37 = vrot.slane %v122_v34, 2 }
  0xa0   :  { %v158_v38 = vmul.f32 %v157_v35, %v157_v35 }
  0xa1   :  { %v124_v39 = vadd.f32 %v123_v37, %v122_v34 }
  0xa2   :  { %v159_v40 = vsel %vm102_vm1, %v158_v38, 0.0 }
  0xa3   :  { %v125_v42 = vrot.slane %v124_v39, 1  ;;  %v160_v43 = vrot.slane %v159_v40, 4 }
  0xa5   :  { %v126_v44 = vadd.f32 %v125_v42, %v124_v39  ;;  %v161_v45 = vadd.f32 %v160_v43, %v159_v40  ;;  %v593_v42 = vld [vmem:[%s818_s8 + $0x18] sm:$0xff] }
  0xa6   :  { %331 = vmatpush.bf16.msra.mxu2 %v593_v42 }
  0xa7   :  { %v127_v47 = vmul.f32 %v126_v44, %v732_v21  ;;  %v162_v48 = vrot.slane %v161_v45, 2 }
  0xa9   :  { %v128_v50 = vadd.f32 1e-05, %v127_v47  ;;  %v163_v51 = vadd.f32 %v162_v48, %v161_v45  ;;  %v592_v47 = vld [vmem:[%s818_s8 + $0x10] sm:$0xff] }
  0xaa   :  { %332 = vmatpush.bf16.msra.mxu2 %v592_v47 }
  0xab   :  { %614 = vrsqrt.f32 %v128_v50  ;;  %v164_v52 = vrot.slane %v163_v51, 1  ;;  %vm135_vm4 = vweird.f32 %v128_v50 }
  0xad   :  { %v165_v53 = vadd.f32 %v164_v52, %v163_v51  ;;  %v591_v52 = vld [vmem:[%s818_s8 + $0x8] sm:$0xff] }
  0xae   :  { %333 = vmatpush.bf16.msra.mxu2 %v591_v52 }
  0xaf   :  { %v166_v54 = vmul.f32 %v165_v53, %v732_v21 }
  0xb1   :  { %v615_v55 = vpop.eup %614  ;;  %v167_v56 = vadd.f32 1e-05, %v166_v54 }
  0xb2   :  { %v130_v57 = vmul.f32 %v615_v55, %v128_v50  ;;  %vm136_vm3 = vweird.f32 %v615_v55 }
  0xb3   :  { %616 = vrsqrt.f32 %v167_v56  ;;  %vm137_vm5 = vmor %vm135_vm4, %vm136_vm3  ;;  %vm174_vm7 = vweird.f32 %v167_v56 }
  0xb4   :  { %v131_v58 = vmul.f32 %v615_v55, %v130_v57 }
  0xb6   :  { %v132_v59 = vmul.f32 0.5, %v131_v58 }
  0xb8   :  { %v133_v60 = vsub.f32 1.5, %v132_v59 }
  0xb9   :  { %v617_v61 = vpop.eup %616 }
  0xba   :  { %v134_v62 = vmul.f32 %v615_v55, %v133_v60  ;;  %v169_v63 = vmul.f32 %v617_v61, %v167_v56  ;;  %vm175_vm6 = vweird.f32 %v617_v61 }
  0xbb   :  { %vm176_vm8 = vmor %vm174_vm7, %vm175_vm6 }
  0xbc   :  { %v138_v0 = vsel %vm137_vm5, %v615_v55, %v134_v62  ;;  %v170_v1 = vmul.f32 %v617_v61, %v169_v63  ;;  %v590_v55 = vld [vmem:[%s818_s8] sm:$0xff] }
  0xbd   :  { %v139_v3 = vmul.f32 %v138_v0, %v118_v26  ;;  %334 = vmatpush.bf16.msra.mxu2 %v590_v55 }
  0xbe   :  { %v171_v2 = vmul.f32 0.5, %v170_v1 }
  0xbf   :  { %v143_v7 = vmul.f32 %v607_v4, %v139_v3 }
  0xc0   :  { %v172_v5 = vsub.f32 1.5, %v171_v2 }
  0xc1   :  { %v147_v12 = vadd.f32 %v608_v8, %v143_v7 }
  0xc2   :  { %v173_v6 = vmul.f32 %v617_v61, %v172_v5 }
  0xc3   :  { %v148_v14 = vmax.f32 %v147_v12, 0.0 }
  0xc4   :  { %v177_v9 = vsel %vm176_vm8, %v617_v61, %v173_v6 }
  0xc5   :  { %v178_v10 = vmul.f32 %v177_v9, %v157_v35 }
  0xc7   :  { %v179_v11 = vmul.f32 %v607_v4, %v178_v10  ;;  %v609_v10 = vld [vmem:[%s816_s6] ss:$0 sm:$0xff] }
  0xc9   :  { %v180_v13 = vadd.f32 %v608_v8, %v179_v11 }
  0xcb   :  { %v181_v15 = vmax.f32 %v180_v13, 0.0 }
  0xcd   :  { %v182_v16 = vpack.c.bf16 %v181_v15, %v148_v14  ;;  %v610_v14 = vld [vmem:[%s817_s7] ss:$0 sm:$0xff] }
  0xcf   :  { %566 = vmatmul.msk.bf16.vlgmr.msra.gmra.mxu1 %vm102_vm1, %v182_v16 }
 0x14c   :  { %v219_v17 = vpop.f32.mrf.mxu1 }
 0x14d   :  { %v224_v18 = vsel %vm102_vm1, %v219_v17, 0.0 }
 0x14e   :  { %v225_v19 = vrot.slane %v224_v18, 4 }
 0x150   :  { %v226_v20 = vadd.f32 %v225_v19, %v224_v18 }
 0x152   :  { %v227_v22 = vrot.slane %v226_v20, 2 }
 0x154   :  { %v228_v23 = vadd.f32 %v227_v22, %v226_v20  ;;  %v221_v24 = vpop.f32.mrf.mxu1 }
 0x155   :  { %v263_v25 = vsel %vm102_vm1, %v221_v24, 0.0 }
 0x156   :  { %v229_v26 = vrot.slane %v228_v23, 1  ;;  %v264_v27 = vrot.slane %v263_v25, 4 }
 0x158   :  { %v230_v28 = vadd.f32 %v229_v26, %v228_v23  ;;  %v265_v29 = vadd.f32 %v264_v27, %v263_v25  ;;  %v611_v25 = vld [vmem:[%s819_s9] ss:$0 sm:$0xff] }
 0x15a   :  { %v231_v30 = vmul.f32 %v230_v28, %v732_v21  ;;  %v266_v31 = vrot.slane %v265_v29, 2 }
 0x15c   :  { %v232_v32 = vsub.f32 %v219_v17, %v231_v30  ;;  %v267_v33 = vadd.f32 %v266_v31, %v265_v29 }
 0x15e   :  { %v233_v34 = vmul.f32 %v232_v32, %v232_v32  ;;  %v268_v35 = vrot.slane %v267_v33, 1 }
 0x160   :  { %v234_v36 = vsel %vm102_vm1, %v233_v34, 0.0  ;;  %v269_v37 = vadd.f32 %v268_v35, %v267_v33 }
 0x161   :  { %v235_v38 = vrot.slane %v234_v36, 4 }
 0x162   :  { %v270_v39 = vmul.f32 %v269_v37, %v732_v21 }
 0x163   :  { %v236_v40 = vadd.f32 %v235_v38, %v234_v36 }
 0x164   :  { %v271_v41 = vsub.f32 %v221_v24, %v270_v39 }
 0x165   :  { %v237_v43 = vrot.slane %v236_v40, 2 }
 0x166   :  { %v272_v44 = vmul.f32 %v271_v41, %v271_v41 }
 0x167   :  { %v238_v45 = vadd.f32 %v237_v43, %v236_v40 }
 0x168   :  { %v273_v46 = vsel %vm102_vm1, %v272_v44, 0.0 }
 0x169   :  { %v239_v48 = vrot.slane %v238_v45, 1  ;;  %v274_v49 = vrot.slane %v273_v46, 4 }
 0x16b   :  { %v240_v50 = vadd.f32 %v239_v48, %v238_v45  ;;  %v275_v51 = vadd.f32 %v274_v49, %v273_v46 }
 0x16d   :  { %v241_v53 = vmul.f32 %v240_v50, %v732_v21  ;;  %v276_v54 = vrot.slane %v275_v51, 2 }
 0x16f   :  { %v242_v56 = vadd.f32 1e-05, %v241_v53  ;;  %v277_v57 = vadd.f32 %v276_v54, %v275_v51 }
 0x171   :  { %618 = vrsqrt.f32 %v242_v56  ;;  %v278_v58 = vrot.slane %v277_v57, 1  ;;  %vm249_vm10 = vweird.f32 %v242_v56 }
 0x173   :  { %v279_v59 = vadd.f32 %v278_v58, %v277_v57 }
 0x175   :  { %v280_v60 = vmul.f32 %v279_v59, %v732_v21 }
 0x177   :  { %v619_v61 = vpop.eup %618  ;;  %v281_v62 = vadd.f32 1e-05, %v280_v60 }
 0x178   :  { %v244_v63 = vmul.f32 %v619_v61, %v242_v56  ;;  %vm250_vm9 = vweird.f32 %v619_v61 }
 0x179   :  { %620 = vrsqrt.f32 %v281_v62  ;;  %vm251_vm11 = vmor %vm249_vm10, %vm250_vm9  ;;  %vm288_vm13 = vweird.f32 %v281_v62 }
 0x17a   :  { %v245_v0 = vmul.f32 %v619_v61, %v244_v63 }
 0x17c   :  { %v246_v1 = vmul.f32 0.5, %v245_v0 }
 0x17e   :  { %v247_v2 = vsub.f32 1.5, %v246_v1 }
 0x17f   :  { %v621_v3 = vpop.eup %620 }
 0x180   :  { %v248_v4 = vmul.f32 %v619_v61, %v247_v2  ;;  %v283_v5 = vmul.f32 %v621_v3, %v281_v62  ;;  %vm289_vm12 = vweird.f32 %v621_v3 }
 0x181   :  { %vm290_vm14 = vmor %vm288_vm13, %vm289_vm12 }
 0x182   :  { %v252_v6 = vsel %vm251_vm11, %v619_v61, %v248_v4  ;;  %v284_v7 = vmul.f32 %v621_v3, %v283_v5  ;;  %v416_v4 = vld [vmem:[%s820_s10] sm:$0xff] }
 0x183   :  { %v253_v9 = vmul.f32 %v252_v6, %v232_v32 }
 0x184   :  { %v285_v8 = vmul.f32 0.5, %v284_v7  ;;  %v417_v7 = vmul.f32 0.00024414063, %v416_v4 }
 0x185   :  { %v257_v13 = vmul.f32 %v609_v10, %v253_v9 }
 0x186   :  { %v286_v11 = vsub.f32 1.5, %v285_v8 }
 0x187   :  { %v261_v18 = vadd.f32 %v610_v14, %v257_v13 }
 0x188   :  { %v287_v12 = vmul.f32 %v621_v3, %v286_v11 }
 0x189   :  { %v262_v20 = vmax.f32 %v261_v18, 0.0 }
 0x18a   :  { %v291_v15 = vsel %vm290_vm14, %v621_v3, %v287_v12 }
 0x18b   :  { %v292_v16 = vmul.f32 %v291_v15, %v271_v41 }
 0x18d   :  { %v293_v17 = vmul.f32 %v609_v10, %v292_v16 }
 0x18f   :  { %v294_v19 = vadd.f32 %v610_v14, %v293_v17 }
 0x191   :  { %v295_v22 = vmax.f32 %v294_v19, 0.0 }
 0x193   :  { %v296_v23 = vpack.c.bf16 %v295_v22, %v262_v20 }
 0x195   :  { %583 = vmatmul.msk.bf16.vlgmr.msra.gmra.mxu2 %vm102_vm1, %v296_v23 }
 0x218   :  { %v336_v24 = vpop.f32.mrf.mxu2 }
 0x219   :  { %v337_v29 = vadd.f32 %v611_v25, %v336_v24 }
 0x21b   :  { %v341_v31 = vmul.f32 %v337_v29, %v337_v29 }
 0x21d   :  { %v343_v32 = vsel %vm84_vm0, %v341_v31, 0.0 }
 0x220   :  { %v338_v26 = vpop.f32.mrf.mxu2 }
 0x221   :  { %v339_v27 = vadd.f32 %v611_v25, %v338_v26 }
 0x223   :  { %v342_v28 = vmul.f32 %v339_v27, %v339_v27 }
 0x225   :  { %v346_v30 = vsel %vm84_vm0, %v342_v28, 0.0 }
 0x226   :  { %347 = vadd.xlane.f32.xlu0 %v346_v30 }
 0x22e   :  { %344 = vadd.xlane.f32.xlu0 %v343_v32 }
 0x299   :  { %v348_v33 = vpop.xlane.xlu0 %347 }
 0x29a   :  { %v350_v34 = vmax.f32 %v348_v33, 1e-24 }
 0x29c   :  { %622 = vrsqrt.f32 %v350_v34  ;;  %vm367_vm1 = vweird.f32 %v350_v34 }
 0x2a1   :  { %v345_v35 = vpop.xlane.xlu0 %344 }
 0x2a2   :  { %v623_v36 = vpop.eup %622  ;;  %v349_v37 = vmax.f32 %v345_v35, 1e-24 }
 0x2a3   :  { %v362_v38 = vmul.f32 %v623_v36, %v350_v34  ;;  %vm368_vm15 = vweird.f32 %v623_v36 }
 0x2a4   :  { %624 = vrsqrt.f32 %v349_v37  ;;  %vm369_vm2 = vmor %vm367_vm1, %vm368_vm15  ;;  %vm357_vm4 = vweird.f32 %v349_v37 }
 0x2a5   :  { %v363_v39 = vmul.f32 %v623_v36, %v362_v38  ;;  %626 = vrcp.f32 %v417_v7 }
 0x2a7   :  { %v364_v40 = vmul.f32 0.5, %v363_v39 }
 0x2a9   :  { %v365_v41 = vsub.f32 1.5, %v364_v40 }
 0x2aa   :  { %v625_v42 = vpop.eup %624 }
 0x2ab   :  { %v366_v43 = vmul.f32 %v623_v36, %v365_v41  ;;  %v352_v44 = vmul.f32 %v625_v42, %v349_v37  ;;  %vm358_vm3 = vweird.f32 %v625_v42  ;;  %v627_v20 = vpop.eup %626 }
 0x2ac   :  { %vm359_vm5 = vmor %vm357_vm4, %vm358_vm3 }
 0x2ad   :  { %v353_v45 = vmul.f32 %v625_v42, %v352_v44  ;;  %v370_v47 = vsel %vm369_vm2, %v623_v36, %v366_v43  ;;  %v510_v43 = vmul.f32 0.99, %v416_v4 }
 0x2ae   :  { %v372_v49 = vmul.f32 %v370_v47, %v339_v27 }
 0x2af   :  { %v354_v46 = vmul.f32 0.5, %v353_v45 }
 0x2b0   :  { %v386_v53 = vrot.slane %v372_v49, 1 }
 0x2b1   :  { %v355_v48 = vsub.f32 1.5, %v354_v46 }
 0x2b3   :  { %v356_v50 = vmul.f32 %v625_v42, %v355_v48 }
 0x2b5   :  { %v360_v51 = vsel %vm359_vm5, %v625_v42, %v356_v50 }
 0x2b6   :  { %v371_v52 = vmul.f32 %v360_v51, %v337_v29 }
 0x2b8   :  { %v373_v54 = vsub.f32 %v371_v52, %v372_v49  ;;  %v388_v55 = vsub.f32 %v371_v52, %v386_v53  ;;  %v387_v56 = vrot.slane %v371_v52, 1 }
 0x2ba   :  { %v378_v57 = vsel %vm84_vm0, %v373_v54, 0.0  ;;  %v389_v58 = vadd.f32 1e-06, %v388_v55  ;;  %v394_v59 = vsub.f32 %v372_v49, %v387_v56  ;;  %v374_v62 = vmul.f32 %v373_v54, %v373_v54 }
 0x2bb   :  { %379 = vadd.xlane.f32.xlu2 %v378_v57 }
 0x2bc   :  { %v390_v60 = vmul.f32 %v389_v58, %v389_v58  ;;  %v395_v63 = vadd.f32 1e-06, %v394_v59  ;;  %v375_v0 = vsel %vm84_vm0, %v374_v62, 0.0 }
 0x2be   :  { %v391_v61 = vsel %vm84_vm0, %v390_v60, 0.0  ;;  %v396_v1 = vmul.f32 %v395_v63, %v395_v63 }
 0x2bf   :  { %392 = vadd.xlane.f32.xlu1 %v391_v61 }
 0x2c0   :  { %v397_v2 = vsel %vm84_vm0, %v396_v1, 0.0  ;;  %vm421_vm0 = vcmask 7168  }
 0x2c3   :  { %376 = vadd.xlane.f32.xlu2 %v375_v0 }
 0x2c7   :  { %398 = vadd.xlane.f32.xlu1 %v397_v2 }
 0x32e   :  { %v380_v3 = vpop.xlane.xlu2 %379 }
 0x32f   :  { %v381_v8 = vmul.f32 2e-06, %v380_v3 }
 0x332   :  { %v393_v5 = vpop.xlane.xlu1 %392 }
 0x333   :  { %v408_v6 = vsub.f32 0.0, %v393_v5 }
 0x335   :  { %v409_v9 = vmul.f32 2.0, %v408_v6 }
 0x336   :  { %v377_v10 = vpop.xlane.xlu2 %376 }
 0x337   :  { %v410_v11 = vmul.f32 1.442695, %v409_v9  ;;  %v382_v12 = vadd.f32 %v381_v8, %v377_v10  ;;  %v384_v13 = vsub.f32 %v377_v10, %v381_v8 }
 0x339   :  { %628 = vpow2.f32 %v410_v11  ;;  %v383_v14 = vadd.f32 3.2e-11, %v382_v12  ;;  %v385_v15 = vadd.f32 3.2e-11, %v384_v13 }
 0x33a   :  { %v399_v16 = vpop.xlane.xlu1 %398 }
 0x33b   :  { %v412_v17 = vsub.f32 0.0, %v399_v16  ;;  %v400_v18 = vmul.f32 2.0, %v383_v14  ;;  %v401_v19 = vmul.f32 2.0, %v385_v15 }
 0x33d   :  { %v413_v22 = vmul.f32 2.0, %v412_v17  ;;  %v422_v23 = vsel %vm421_vm0, %v400_v18, 0.0  ;;  %v402_v24 = vsub.f32 0.0, %v400_v18  ;;  %v461_v25 = vsel %vm421_vm0, %v401_v19, 0.0 }
 0x33e   :  { %423 = vadd.xlane.f32.xlu0 %v422_v23  ;;  %462 = vadd.xlane.f32.xlu2 %v461_v25  ;;  %v405_v26 = vsub.f32 0.0, %v401_v19 }
 0x33f   :  { %v629_v27 = vpop.eup %628  ;;  %v414_v28 = vmul.f32 1.442695, %v413_v22  ;;  %v403_v29 = vmul.f32 1.442695, %v402_v24 }
 0x340   :  { %v406_v30 = vmul.f32 1.442695, %v405_v26  ;;  %v419_v31 = vmul.f32 %v629_v27, %v627_v20  ;;  %v505_v38 = vmul.f32 0.5, %v629_v27 }
 0x341   :  { %630 = vpow2.f32 %v414_v28 }
 0x342   :  { %632 = vpow2.f32 %v403_v29  ;;  %v441_v32 = vsel %vm421_vm0, %v419_v31, 0.0 }
 0x343   :  { %634 = vpow2.f32 %v406_v30  ;;  %442 = vadd.xlane.f32.xlu1 %v441_v32 }
 0x347   :  { %v631_v33 = vpop.eup %630 }
 0x348   :  { %v633_v34 = vpop.eup %632  ;;  %v508_v35 = vmul.f32 0.5, %v631_v33  ;;  %v420_v36 = vmul.f32 %v631_v33, %v627_v20 }
 0x349   :  { %v635_v37 = vpop.eup %634  ;;  %v504_v39 = vmul.f32 0.5, %v633_v34 }
 0x34a   :  { %v507_v40 = vmul.f32 0.5, %v635_v37  ;;  %v481_v41 = vsel %vm421_vm0, %v420_v36, 0.0 }
 0x34b   :  { %v506_v42 = vadd.f32 %v505_v38, %v504_v39  ;;  %482 = vadd.xlane.f32.xlu0 %v481_v41 }
 0x34c   :  { %v509_v44 = vadd.f32 %v508_v35, %v507_v40 }
 0x34d   :  { %v511_v45 = vmul.f32 40.96, %v506_v42 }
 0x34e   :  { %v513_v46 = vmul.f32 40.96, %v509_v44 }
 0x34f   :  { %v512_v47 = vadd.f32 %v511_v45, %v510_v43 }
 0x350   :  { %v514_v48 = vadd.f32 %v513_v46, %v510_v43 }
 0x352   :  { %v515_v49 = vadd.f32 %v514_v48, %v512_v47 }
 0x354   :  { %v516_v50 = vmul.f32 0.5, %v515_v49 }
 0x356   :  { %517 = vst.msk [vmem:[%s822_s12] sm:$0xff] %vm421_vm0, %v516_v50 }
 0x3b1   :  { %v424_v51 = vpop.xlane.xlu0 %423  ;;  %v463_v52 = vpop.xlane.xlu2 %462 }
 0x3b2   :  { %v425_v53 = vrot.slane %v424_v51, 4  ;;  %v464_v54 = vrot.slane %v463_v52, 4 }
 0x3b4   :  { %v426_v55 = vadd.f32 %v425_v53, %v424_v51  ;;  %v465_v56 = vadd.f32 %v464_v54, %v463_v52 }
 0x3b6   :  { %v427_v57 = vrot.slane %v426_v55, 2  ;;  %v466_v58 = vrot.slane %v465_v56, 2  ;;  %v443_v59 = vpop.xlane.xlu1 %442 }
 0x3b7   :  { %v444_v60 = vrot.slane %v443_v59, 4 }
 0x3b8   :  { %v428_v61 = vadd.f32 %v427_v57, %v426_v55  ;;  %v467_v63 = vadd.f32 %v466_v58, %v465_v56 }
 0x3b9   :  { %v445_v62 = vadd.f32 %v444_v60, %v443_v59 }
 0x3ba   :  { %v429_v0 = vrot.slane %v428_v61, 1  ;;  %v468_v5 = vrot.slane %v467_v63, 1 }
 0x3bb   :  { %v446_v1 = vrot.slane %v445_v62, 2 }
 0x3bc   :  { %v430_v2 = vadd.f32 %v429_v0, %v428_v61  ;;  %v469_v10 = vadd.f32 %v468_v5, %v467_v63 }
 0x3bd   :  { %v447_v3 = vadd.f32 %v446_v1, %v445_v62 }
 0x3be   :  { %595 = vpush %v430_v2  ;;  %v483_v4 = vpop.xlane.xlu0 %482 }
 0x3bf   :  { %597 = vpush %v732_v21  ;;  %v484_v6 = vrot.slane %v483_v4, 4  ;;  %v448_v7 = vrot.slane %v447_v3, 1 }
 0x3c1   :  { %v485_v8 = vadd.f32 %v484_v6, %v483_v4  ;;  %v449_v9 = vadd.f32 %v448_v7, %v447_v3 }
 0x3c3   :  { %v486_v11 = vrot.slane %v485_v8, 2  ;;  %599 = vpush %v449_v9 }
 0x3c4   :  { %601 = vpush %v469_v10 }
 0x3c5   :  { %v487_v12 = vadd.f32 %v486_v11, %v485_v8 }
 0x3c7   :  { %v488_v13 = vrot.slane %v487_v12, 1 }
 0x3c9   :  { %v489_v14 = vadd.f32 %v488_v13, %v487_v12 }
 0x3cb   :  { %603 = vpush %v489_v14 }
 0x3ef   :  { %s596_s12 = spop %595 }
 0x3f0   :  { %s598_s1 = spop %597 }
 0x3f1   :  { %s440_s30 = smul.f32 %s598_s1, %s596_s12 }
 0x3f4   :  { %s600_s2 = spop %599 }
 0x3f5   :  { %s459_s29 = smul.f32 %s600_s2, %s598_s1  ;;  %s602_s13 = spop %601 }
 0x3f6   :  { %s479_s15 = smul.f32 %s602_s13, %s598_s1 }
 0x3f7   :  { %s460_s14 = sadd.f32 %s459_s29, %s440_s30 }
 0x3f9   :  { %s480_s16 = sadd.f32 %s479_s15, %s460_s14 }
 0x3fc   :  { %s604_s5 = spop %603 }
 0x3fd   :  { %s499_s17 = smul.f32 %s604_s5, %s598_s1 }
 0x3ff   :  { %s500_s19 = sadd.f32 %s499_s17, %s480_s16 }
 0x401   :  { %s501_s20 = smul.f32 0.5, %s500_s19 }
 0x403   :  { %503 = sst [smem:[#allocation2]] %s501_s20 }
 0x404   :  { %526 = dma.smem_to_hbm %s651_s21, 16, %s524_s4, [#allocation3]  }
 0x405   :  { %648 = dma.done.wait [#allocation3], 16  }
 0x406   :  { %649 = vsyncadd [#allocation3], 4294967280 }
 0x407   :  { %535 = sfence }
 0x408   :  { %536 = vsyncpa [#allocation3], 1 }

</bundles_post_ra>
